<compile_context>
chip_gen: v7x
topology: tpu7x:2x2x1
jax: 0.10.0
libtpu: 0.0.40
codegen_flags: <defaults>
</compile_context>

<pallas_src>
import jax
import jax.numpy as jnp
import numpy as np
from jax.experimental import pallas as pl
from jax.experimental.pallas import tpu as pltpu


def _silu(x):
    return x * jax.nn.sigmoid(x)


# ----------------------------------------------------------------------------
# Fused C2f kernel (one grid step == one group of images, all in VMEM/vregs)
# ----------------------------------------------------------------------------
def _make_c2f_kernel(W, L, c, n, shortcut, mxu_dtype):
    # Output position p reads input position p + off, off = (kh-1)*W + (kw-1).
    # pltpu.roll by (-off) mod L realizes that shift on the lane axis.
    offs = [(kh - 1) * W + (kw - 1) for kh in range(3) for kw in range(3)]
    shifts = [(-o) % L for o in offs]
    CENTER = 4                                    # tap (kh=1,kw=1): no roll/mask

    def kernel(*refs):
        if shortcut:
            (x_ref, mask_ref, w1_ref, s1_ref, b1_ref,
             wb1_ref, sb1_ref, bb1_ref,
             wb2_ref, sb2_ref, bb2_ref,
             w2_ref, s2_ref, b2_ref, o_ref) = refs
        else:
            (x_ref, mask_ref, w1_ref, s1_ref, b1_ref,
             wb2_ref, sb2_ref, bb2_ref,
             w2_ref, s2_ref, b2_ref, o_ref) = refs

        # Hoist the 9 validity-mask rows once per grid step; reused by every
        # 3x3 conv below.  Each is a (1, L) lane vector (broadcast over c).
        mask_rows = [mask_ref[pl.ds(t, 1), :] for t in range(9)]

        def conv1x1(w, s, b, xin):
            acc = jnp.dot(w.astype(mxu_dtype), xin.astype(mxu_dtype),
                          preferred_element_type=jnp.float32)
            return _silu(acc * s + b)

        def conv3x3(w, s, b, xin):
            # 3x3 "same" conv as ONE K=9c matmul.  Taps are XLU lane rolls of
            # the (c, L) activation; image-boundary / wrap-around lanes are
            # exactly the mask-zeroed positions, so numerics are unchanged.
            taps = []
            for t in range(9):
                tap = xin if shifts[t] == 0 else pltpu.roll(xin, shifts[t], axis=1)
                if t != CENTER:
                    tap = tap * mask_rows[t]
                taps.append(tap)
            col = jnp.concatenate(taps, axis=0)          # (9c, L), stays in vregs
            acc = jnp.dot(w.astype(mxu_dtype), col.astype(mxu_dtype),
                          preferred_element_type=jnp.float32)
            return _silu(acc * s + b)

        x = x_ref[...]                                   # (C1, L)

        # cv1 (1x1) as a single matmul; the channel chunk is a value slice.
        y01 = conv1x1(w1_ref[...], s1_ref[...], b1_ref[...], x)   # (2c, L)

        ys = [y01]                                       # y[0] || y[1] == y01
        prev = y01[c:2 * c, :]                           # y[-1] for first m
        for i in range(n):
            if shortcut:                                 # x + cv2(cv1(x))
                t1 = conv3x3(wb1_ref[i], sb1_ref[i], bb1_ref[i], prev)
                t2 = conv3x3(wb2_ref[i], sb2_ref[i], bb2_ref[i], t1)
                prev = prev + t2
            else:                                        # reference: cv2(cv2(x))
                t1 = conv3x3(wb2_ref[i], sb2_ref[i], bb2_ref[i], prev)
                prev = conv3x3(wb2_ref[i], sb2_ref[i], bb2_ref[i], t1)
            ys.append(prev)

        # cv2 (1x1) over the implicit concat: ONE K=(2+n)c matmul.
        cat = jnp.concatenate(ys, axis=0)                # ((2+n)c, L)
        acc = jnp.dot(w2_ref[...].astype(mxu_dtype), cat.astype(mxu_dtype),
                      preferred_element_type=jnp.float32)
        o_ref[...] = _silu(acc * s2_ref[...] + b2_ref[...]).astype(o_ref.dtype)

    return kernel


def _full_spec(arr):
    nd = arr.ndim
    return pl.BlockSpec(arr.shape, lambda i, _nd=nd: (0,) * _nd)


def c2f_forward_pallas(x_nchw, params, n=1, shortcut=False,
                       images_per_block=None, mxu_dtype=jnp.float32):
    N, C1, H, W = x_nchw.shape
    HW = H * W
    cv1, cv2 = params["cv1"], params["cv2"]
    c = cv1["w"].shape[-1] // 2
    C2 = cv2["w"].shape[-1]

    # ---- fold the batch into the lane dimension -----------------------------
    if images_per_block is None:
        images_per_block = min(N, max(1, 512 // HW))     # aim for >=512 lanes
        # but keep >=2 parallel grid steps when N allows (v7x: 2 TensorCores)
        while images_per_block > 1 and (N % images_per_block != 0
                                        or N // images_per_block < 2):
            images_per_block -= 1
    assert N % images_per_block == 0
    NB = images_per_block
    L = NB * HW
    grid = (N // NB,)

    # ---- host-side weight plumbing (tiny tensors, done once per call) -------
    # cv1 (1x1): HWIO (1,1,C1,2c) -> weight-stationary (2c, C1), single matmul
    w1 = jnp.transpose(cv1["w"][0, 0], (1, 0))
    s1 = cv1["scale"].reshape(2 * c, 1)
    b1 = cv1["bias"].reshape(2 * c, 1)

    def _w3(w):  # HWIO (3,3,ci,co) -> (co, 9*ci), columns ordered (kh,kw,ci)
        return jnp.transpose(w, (3, 0, 1, 2)).reshape(w.shape[-1], -1)

    wb2 = jnp.stack([_w3(params["m"][i]["cv2"]["w"]) for i in range(n)])
    sb2 = jnp.stack([params["m"][i]["cv2"]["scale"].reshape(c, 1) for i in range(n)])
    bb2 = jnp.stack([params["m"][i]["cv2"]["bias"].reshape(c, 1) for i in range(n)])
    if shortcut:
        wb1 = jnp.stack([_w3(params["m"][i]["cv1"]["w"]) for i in range(n)])
        sb1 = jnp.stack([params["m"][i]["cv1"]["scale"].reshape(c, 1) for i in range(n)])
        bb1 = jnp.stack([params["m"][i]["cv1"]["bias"].reshape(c, 1) for i in range(n)])

    # cv2 (1x1): HWIO (1,1,(2+n)c,C2) -> (C2, (2+n)c), no per-branch split
    w2 = jnp.transpose(cv2["w"][0, 0], (1, 0))
    s2 = cv2["scale"].reshape(C2, 1)
    b2 = cv2["bias"].reshape(C2, 1)

    # ---- per-tap validity masks, tiled over the images of one lane block ----
    hh = np.arange(H)[:, None]
    ww = np.arange(W)[None, :]
    m_np = np.zeros((9, HW), np.float32)
    t = 0
    for kh in range(3):
        for kw in range(3):
            dh, dw = kh - 1, kw - 1
            valid = ((hh + dh >= 0) & (hh + dh < H) &
                     (ww + dw >= 0) & (ww + dw < W))
            m_np[t] = valid.reshape(-1).astype(np.float32)
            t += 1
    masks = jnp.asarray(np.tile(m_np, (1, NB)))          # (9, L)

    # NCHW -> (C1, N*H*W): images contiguous along the (lane) last dim.
    x2 = jnp.transpose(x_nchw, (1, 0, 2, 3)).reshape(C1, N * HW)

    inputs = [x2, masks, w1, s1, b1]
    if shortcut:
        inputs += [wb1, sb1, bb1]
    inputs += [wb2, sb2, bb2, w2, s2, b2]

    in_specs = [pl.BlockSpec((C1, L), lambda i: (0, i))]
    in_specs += [_full_spec(a) for a in inputs[1:]]

    kernel = _make_c2f_kernel(W, L, c, n, shortcut, mxu_dtype)
    out = pl.pallas_call(
        kernel,
        out_shape=jax.ShapeDtypeStruct((C2, N * HW), x_nchw.dtype),
        grid=grid,
        in_specs=in_specs,
        out_specs=pl.BlockSpec((C2, L), lambda i: (0, i)),
        compiler_params=pltpu.CompilerParams(
            dimension_semantics=("parallel",)),
        # NOTE: for realistic YOLO sizes (large H*W, large c) add a spatial
        # lane tile and raise vmem_limit_bytes here (v7x has 64 MiB physical);
        # the demo footprint is a few tens of KiB so defaults are fine.
    )(*inputs)

    return jnp.transpose(out.reshape(C2, N, H, W), (1, 0, 2, 3))


# ----------------------------------------------------------------------------
# Parameter init (deterministic, BN folded into per-channel scale/bias)
# ----------------------------------------------------------------------------
def init_conv_params(key, cin, cout, k):
    kw_, kg, kb, km, kv = jax.random.split(key, 5)
    w = jax.random.normal(kw_, (k, k, cin, cout), jnp.float32)
    w = w * (1.0 / np.sqrt(cin * k * k))
    gamma = 1.0 + 0.1 * jax.random.normal(kg, (cout,), jnp.float32)
    beta = 0.1 * jax.random.normal(kb, (cout,), jnp.float32)
    mean = 0.1 * jax.random.normal(km, (cout,), jnp.float32)
    var = jax.random.uniform(kv, (cout,), jnp.float32, minval=0.5, maxval=1.5)
    eps = 1e-5  # nn.BatchNorm2d default
    scale = gamma / jnp.sqrt(var + eps)
    bias = beta - mean * scale
    return {"w": w, "scale": scale, "bias": bias}


def init_c2f_params(key, c1, c2, n=1, e=0.5):
    c = int(c2 * e)
    keys = jax.random.split(key, 2 + 2 * n)
    params = {
        "cv1": init_conv_params(keys[0], c1, 2 * c, 1),
        "cv2": init_conv_params(keys[1], (2 + n) * c, c2, 1),
        "m": [],
    }
    for i in range(n):
        # Bottleneck(c, c, shortcut, g=1, k=((3,3),(3,3)), e=1.0) -> c_ = c
        params["m"].append({
            "cv1": init_conv_params(keys[2 + 2 * i], c, c, 3),  # unused if not shortcut
            "cv2": init_conv_params(keys[3 + 2 * i], c, c, 3),
        })
    return params, c


# ----------------------------------------------------------------------------
# Pure-JAX reference
# ----------------------------------------------------------------------------
def _ref_conv(x_nhwc, w_hwio, scale, bias, padding):
    y = jax.lax.conv_general_dilated(
        x_nhwc, w_hwio, (1, 1), padding,
        dimension_numbers=("NHWC", "HWIO", "NHWC"))
    return _silu(y * scale + bias)


def c2f_forward_ref(x_nchw, params, n=1, shortcut=False):
    x = jnp.transpose(x_nchw, (0, 2, 3, 1))
    cv1 = params["cv1"]
    y = _ref_conv(x, cv1["w"], cv1["scale"], cv1["bias"], "VALID")
    c = y.shape[-1] // 2
    ys = [y[..., :c], y[..., c:]]
    for i in range(n):
        bp = params["m"][i]
        last = ys[-1]
        if shortcut:
            t = _ref_conv(last, bp["cv1"]["w"], bp["cv1"]["scale"], bp["cv1"]["bias"], "SAME")
            t = _ref_conv(t, bp["cv2"]["w"], bp["cv2"]["scale"], bp["cv2"]["bias"], "SAME")
            ys.append(last + t)
        else:
            t = _ref_conv(last, bp["cv2"]["w"], bp["cv2"]["scale"], bp["cv2"]["bias"], "SAME")
            t = _ref_conv(t, bp["cv2"]["w"], bp["cv2"]["scale"], bp["cv2"]["bias"], "SAME")
            ys.append(t)
    cat = jnp.concatenate(ys, axis=-1)
    cv2 = params["cv2"]
    out = _ref_conv(cat, cv2["w"], cv2["scale"], cv2["bias"], "VALID")
    return jnp.transpose(out, (0, 3, 1, 2))


# ----------------------------------------------------------------------------
if __name__ == "__main__":
    key = jax.random.PRNGKey(0)
    kx, kp = jax.random.split(key)

    # C2f(c1=8, c2=8, n=1, shortcut=False, e=0.5) -> hidden c = 4
    N, C1, C2, H, W, n_bottleneck = 2, 8, 8, 16, 16, 1
    x = jax.random.normal(kx, (N, C1, H, W), jnp.float32)        # NCHW input

    params, c_hidden = init_c2f_params(kp, C1, C2, n=n_bottleneck, e=0.5)

    # mxu_dtype=jnp.bfloat16 is the v6e/v7x setting (f32 accumulate/epilogue);
    # keep f32 here so the check against the f32 reference is exact.
    out = jax.block_until_ready(
        c2f_forward_pallas(x, params, n=n_bottleneck, shortcut=False,
                           mxu_dtype=jnp.float32))
    ref = jax.block_until_ready(
        c2f_forward_ref(x, params, n=n_bottleneck, shortcut=False))

    assert out.shape == (N, C2, H, W), out.shape
    np.testing.assert_allclose(np.asarray(out), np.asarray(ref),
                               rtol=1e-4, atol=1e-4)
    print("KERNEL_OK")
</pallas_src>

<mosaic_0001>
module attributes {stable_mosaic.version = 11 : i64} {
  func.func @kernel(%arg0: i32, %arg1: memref<8x256xf32, #tpu.memory_space<vmem>>, %arg2: memref<9x256xf32, #tpu.memory_space<vmem>>, %arg3: memref<8x8xf32, #tpu.memory_space<vmem>>, %arg4: memref<8x1xf32, #tpu.memory_space<vmem>>, %arg5: memref<8x1xf32, #tpu.memory_space<vmem>>, %arg6: memref<1x4x36xf32, #tpu.memory_space<vmem>>, %arg7: memref<1x4x1xf32, #tpu.memory_space<vmem>>, %arg8: memref<1x4x1xf32, #tpu.memory_space<vmem>>, %arg9: memref<8x12xf32, #tpu.memory_space<vmem>>, %arg10: memref<8x1xf32, #tpu.memory_space<vmem>>, %arg11: memref<8x1xf32, #tpu.memory_space<vmem>>, %arg12: memref<8x256xf32, #tpu.memory_space<vmem>>) attributes {dimension_semantics = [#tpu.dimension_semantics<parallel>], iteration_bounds = array<i64: 2>, scalar_prefetch = 0 : i64, scratch_operands = 0 : i64, tpu.core_type = #tpu.core_type<tc>, window_params = [{transform_indices = @transform_0, window_bounds = array<i64: 8, 256>}, {pipeline_mode = #tpu.pipeline_mode<synchronous>, transform_indices = @transform_1, window_bounds = array<i64: 9, 256>}, {pipeline_mode = #tpu.pipeline_mode<synchronous>, transform_indices = @transform_2, window_bounds = array<i64: 8, 8>}, {pipeline_mode = #tpu.pipeline_mode<synchronous>, transform_indices = @transform_3, window_bounds = array<i64: 8, 1>}, {pipeline_mode = #tpu.pipeline_mode<synchronous>, transform_indices = @transform_4, window_bounds = array<i64: 8, 1>}, {pipeline_mode = #tpu.pipeline_mode<synchronous>, transform_indices = @transform_5, window_bounds = array<i64: 1, 4, 36>}, {pipeline_mode = #tpu.pipeline_mode<synchronous>, transform_indices = @transform_6, window_bounds = array<i64: 1, 4, 1>}, {pipeline_mode = #tpu.pipeline_mode<synchronous>, transform_indices = @transform_7, window_bounds = array<i64: 1, 4, 1>}, {pipeline_mode = #tpu.pipeline_mode<synchronous>, transform_indices = @transform_8, window_bounds = array<i64: 8, 12>}, {pipeline_mode = #tpu.pipeline_mode<synchronous>, transform_indices = @transform_9, window_bounds = array<i64: 8, 1>}, {pipeline_mode = #tpu.pipeline_mode<synchronous>, transform_indices = @transform_10, window_bounds = array<i64: 8, 1>}, {transform_indices = @transform_11, window_bounds = array<i64: 8, 256>}]} {
    %c0 = arith.constant 0 : index
    %c0_0 = arith.constant 0 : index
    %0 = vector.load %arg2[%c0, %c0_0] : memref<9x256xf32, #tpu.memory_space<vmem>>, vector<1x256xf32>
    %c1 = arith.constant 1 : index
    %c0_1 = arith.constant 0 : index
    %1 = vector.load %arg2[%c1, %c0_1] : memref<9x256xf32, #tpu.memory_space<vmem>>, vector<1x256xf32>
    %c2 = arith.constant 2 : index
    %c0_2 = arith.constant 0 : index
    %2 = vector.load %arg2[%c2, %c0_2] : memref<9x256xf32, #tpu.memory_space<vmem>>, vector<1x256xf32>
    %c3 = arith.constant 3 : index
    %c0_3 = arith.constant 0 : index
    %3 = vector.load %arg2[%c3, %c0_3] : memref<9x256xf32, #tpu.memory_space<vmem>>, vector<1x256xf32>
    %c5 = arith.constant 5 : index
    %c0_4 = arith.constant 0 : index
    %4 = vector.load %arg2[%c5, %c0_4] : memref<9x256xf32, #tpu.memory_space<vmem>>, vector<1x256xf32>
    %c6 = arith.constant 6 : index
    %c0_5 = arith.constant 0 : index
    %5 = vector.load %arg2[%c6, %c0_5] : memref<9x256xf32, #tpu.memory_space<vmem>>, vector<1x256xf32>
    %c7 = arith.constant 7 : index
    %c0_6 = arith.constant 0 : index
    %6 = vector.load %arg2[%c7, %c0_6] : memref<9x256xf32, #tpu.memory_space<vmem>>, vector<1x256xf32>
    %c8 = arith.constant 8 : index
    %c0_7 = arith.constant 0 : index
    %7 = vector.load %arg2[%c8, %c0_7] : memref<9x256xf32, #tpu.memory_space<vmem>>, vector<1x256xf32>
    %c0_8 = arith.constant 0 : index
    %c0_9 = arith.constant 0 : index
    %8 = vector.load %arg1[%c0_8, %c0_9] : memref<8x256xf32, #tpu.memory_space<vmem>>, vector<8x256xf32>
    %c0_10 = arith.constant 0 : index
    %c0_11 = arith.constant 0 : index
    %9 = vector.load %arg3[%c0_10, %c0_11] : memref<8x8xf32, #tpu.memory_space<vmem>>, vector<8x8xf32>
    %c0_12 = arith.constant 0 : index
    %c0_13 = arith.constant 0 : index
    %10 = vector.load %arg4[%c0_12, %c0_13] : memref<8x1xf32, #tpu.memory_space<vmem>>, vector<8x1xf32>
    %c0_14 = arith.constant 0 : index
    %c0_15 = arith.constant 0 : index
    %11 = vector.load %arg5[%c0_14, %c0_15] : memref<8x1xf32, #tpu.memory_space<vmem>>, vector<8x1xf32>
    %cst = arith.constant dense<0.000000e+00> : vector<8x256xf32>
    %12 = tpu.matmul %9, %8, %cst {dimension_numbers = #tpu.dot_dimension_numbers<[1], [0], [0], [1], [0, 0, 1, 1], [], []>} : vector<8x8xf32>, vector<8x256xf32>, vector<8x256xf32> -> vector<8x256xf32>
    %13 = vector.broadcast %10 : vector<8x1xf32> to vector<8x256xf32>
    %14 = arith.mulf %12, %13 : vector<8x256xf32>
    %15 = vector.broadcast %11 : vector<8x1xf32> to vector<8x256xf32>
    %16 = arith.addf %14, %15 : vector<8x256xf32>
    %17 = arith.negf %16 : vector<8x256xf32>
    %18 = math.exp %17 : vector<8x256xf32>
    %cst_16 = arith.constant 1.000000e+00 : f32
    %19 = vector.broadcast %cst_16 : f32 to vector<8x256xf32>
    %20 = arith.addf %19, %18 : vector<8x256xf32>
    %21 = arith.divf %19, %20 : vector<8x256xf32>
    %22 = arith.mulf %16, %21 : vector<8x256xf32>
    %23 = vector.extract_strided_slice %22 {offsets = [4, 0], sizes = [4, 256], strides = [1, 1]} : vector<8x256xf32> to vector<4x256xf32>
    %c0_17 = arith.constant 0 : index
    %c0_18 = arith.constant 0 : index
    %c0_19 = arith.constant 0 : index
    %24 = vector.load %arg6[%c0_17, %c0_18, %c0_19] : memref<1x4x36xf32, #tpu.memory_space<vmem>>, vector<1x4x36xf32>
    %25 = vector.shape_cast %24 : vector<1x4x36xf32> to vector<4x36xf32>
    %c0_20 = arith.constant 0 : index
    %c0_21 = arith.constant 0 : index
    %c0_22 = arith.constant 0 : index
    %26 = vector.load %arg7[%c0_20, %c0_21, %c0_22] : memref<1x4x1xf32, #tpu.memory_space<vmem>>, vector<1x4x1xf32>
    %27 = vector.shape_cast %26 : vector<1x4x1xf32> to vector<4x1xf32>
    %c0_23 = arith.constant 0 : index
    %c0_24 = arith.constant 0 : index
    %c0_25 = arith.constant 0 : index
    %28 = vector.load %arg8[%c0_23, %c0_24, %c0_25] : memref<1x4x1xf32, #tpu.memory_space<vmem>>, vector<1x4x1xf32>
    %29 = vector.shape_cast %28 : vector<1x4x1xf32> to vector<4x1xf32>
    %c17_i32 = arith.constant 17 : i32
    %30 = tpu.dynamic_rotate %23 by %c17_i32 dim 1 : vector<4x256xf32>, i32 -> vector<4x256xf32>
    %31 = vector.broadcast %0 : vector<1x256xf32> to vector<4x256xf32>
    %32 = arith.mulf %30, %31 : vector<4x256xf32>
    %c16_i32 = arith.constant 16 : i32
    %33 = tpu.dynamic_rotate %23 by %c16_i32 dim 1 : vector<4x256xf32>, i32 -> vector<4x256xf32>
    %34 = vector.broadcast %1 : vector<1x256xf32> to vector<4x256xf32>
    %35 = arith.mulf %33, %34 : vector<4x256xf32>
    %c15_i32 = arith.constant 15 : i32
    %36 = tpu.dynamic_rotate %23 by %c15_i32 dim 1 : vector<4x256xf32>, i32 -> vector<4x256xf32>
    %37 = vector.broadcast %2 : vector<1x256xf32> to vector<4x256xf32>
    %38 = arith.mulf %36, %37 : vector<4x256xf32>
    %c1_i32 = arith.constant 1 : i32
    %39 = tpu.dynamic_rotate %23 by %c1_i32 dim 1 : vector<4x256xf32>, i32 -> vector<4x256xf32>
    %40 = vector.broadcast %3 : vector<1x256xf32> to vector<4x256xf32>
    %41 = arith.mulf %39, %40 : vector<4x256xf32>
    %c255_i32 = arith.constant 255 : i32
    %42 = tpu.dynamic_rotate %23 by %c255_i32 dim 1 : vector<4x256xf32>, i32 -> vector<4x256xf32>
    %43 = vector.broadcast %4 : vector<1x256xf32> to vector<4x256xf32>
    %44 = arith.mulf %42, %43 : vector<4x256xf32>
    %c241_i32 = arith.constant 241 : i32
    %45 = tpu.dynamic_rotate %23 by %c241_i32 dim 1 : vector<4x256xf32>, i32 -> vector<4x256xf32>
    %46 = vector.broadcast %5 : vector<1x256xf32> to vector<4x256xf32>
    %47 = arith.mulf %45, %46 : vector<4x256xf32>
    %c240_i32 = arith.constant 240 : i32
    %48 = tpu.dynamic_rotate %23 by %c240_i32 dim 1 : vector<4x256xf32>, i32 -> vector<4x256xf32>
    %49 = vector.broadcast %6 : vector<1x256xf32> to vector<4x256xf32>
    %50 = arith.mulf %48, %49 : vector<4x256xf32>
    %c239_i32 = arith.constant 239 : i32
    %51 = tpu.dynamic_rotate %23 by %c239_i32 dim 1 : vector<4x256xf32>, i32 -> vector<4x256xf32>
    %52 = vector.broadcast %7 : vector<1x256xf32> to vector<4x256xf32>
    %53 = arith.mulf %51, %52 : vector<4x256xf32>
    %54 = tpu.concatenate %32, %35, %38, %41, %23, %44, %47, %50, %53 in 0 : vector<4x256xf32>, vector<4x256xf32>, vector<4x256xf32>, vector<4x256xf32>, vector<4x256xf32>, vector<4x256xf32>, vector<4x256xf32>, vector<4x256xf32>, vector<4x256xf32> -> vector<36x256xf32>
    %cst_26 = arith.constant dense<0.000000e+00> : vector<4x256xf32>
    %55 = tpu.matmul %25, %54, %cst_26 {dimension_numbers = #tpu.dot_dimension_numbers<[1], [0], [0], [1], [0, 0, 1, 1], [], []>} : vector<4x36xf32>, vector<36x256xf32>, vector<4x256xf32> -> vector<4x256xf32>
    %56 = vector.broadcast %27 : vector<4x1xf32> to vector<4x256xf32>
    %57 = arith.mulf %55, %56 : vector<4x256xf32>
    %58 = vector.broadcast %29 : vector<4x1xf32> to vector<4x256xf32>
    %59 = arith.addf %57, %58 : vector<4x256xf32>
    %60 = arith.negf %59 : vector<4x256xf32>
    %61 = math.exp %60 : vector<4x256xf32>
    %cst_27 = arith.constant 1.000000e+00 : f32
    %62 = vector.broadcast %cst_27 : f32 to vector<4x256xf32>
    %63 = arith.addf %62, %61 : vector<4x256xf32>
    %64 = arith.divf %62, %63 : vector<4x256xf32>
    %65 = arith.mulf %59, %64 : vector<4x256xf32>
    %c0_28 = arith.constant 0 : index
    %c0_29 = arith.constant 0 : index
    %c0_30 = arith.constant 0 : index
    %66 = vector.load %arg6[%c0_28, %c0_29, %c0_30] : memref<1x4x36xf32, #tpu.memory_space<vmem>>, vector<1x4x36xf32>
    %67 = vector.shape_cast %66 : vector<1x4x36xf32> to vector<4x36xf32>
    %c0_31 = arith.constant 0 : index
    %c0_32 = arith.constant 0 : index
    %c0_33 = arith.constant 0 : index
    %68 = vector.load %arg7[%c0_31, %c0_32, %c0_33] : memref<1x4x1xf32, #tpu.memory_space<vmem>>, vector<1x4x1xf32>
    %69 = vector.shape_cast %68 : vector<1x4x1xf32> to vector<4x1xf32>
    %c0_34 = arith.constant 0 : index
    %c0_35 = arith.constant 0 : index
    %c0_36 = arith.constant 0 : index
    %70 = vector.load %arg8[%c0_34, %c0_35, %c0_36] : memref<1x4x1xf32, #tpu.memory_space<vmem>>, vector<1x4x1xf32>
    %71 = vector.shape_cast %70 : vector<1x4x1xf32> to vector<4x1xf32>
    %c17_i32_37 = arith.constant 17 : i32
    %72 = tpu.dynamic_rotate %65 by %c17_i32_37 dim 1 : vector<4x256xf32>, i32 -> vector<4x256xf32>
    %73 = vector.broadcast %0 : vector<1x256xf32> to vector<4x256xf32>
    %74 = arith.mulf %72, %73 : vector<4x256xf32>
    %c16_i32_38 = arith.constant 16 : i32
    %75 = tpu.dynamic_rotate %65 by %c16_i32_38 dim 1 : vector<4x256xf32>, i32 -> vector<4x256xf32>
    %76 = vector.broadcast %1 : vector<1x256xf32> to vector<4x256xf32>
    %77 = arith.mulf %75, %76 : vector<4x256xf32>
    %c15_i32_39 = arith.constant 15 : i32
    %78 = tpu.dynamic_rotate %65 by %c15_i32_39 dim 1 : vector<4x256xf32>, i32 -> vector<4x256xf32>
    %79 = vector.broadcast %2 : vector<1x256xf32> to vector<4x256xf32>
    %80 = arith.mulf %78, %79 : vector<4x256xf32>
    %c1_i32_40 = arith.constant 1 : i32
    %81 = tpu.dynamic_rotate %65 by %c1_i32_40 dim 1 : vector<4x256xf32>, i32 -> vector<4x256xf32>
    %82 = vector.broadcast %3 : vector<1x256xf32> to vector<4x256xf32>
    %83 = arith.mulf %81, %82 : vector<4x256xf32>
    %c255_i32_41 = arith.constant 255 : i32
    %84 = tpu.dynamic_rotate %65 by %c255_i32_41 dim 1 : vector<4x256xf32>, i32 -> vector<4x256xf32>
    %85 = vector.broadcast %4 : vector<1x256xf32> to vector<4x256xf32>
    %86 = arith.mulf %84, %85 : vector<4x256xf32>
    %c241_i32_42 = arith.constant 241 : i32
    %87 = tpu.dynamic_rotate %65 by %c241_i32_42 dim 1 : vector<4x256xf32>, i32 -> vector<4x256xf32>
    %88 = vector.broadcast %5 : vector<1x256xf32> to vector<4x256xf32>
    %89 = arith.mulf %87, %88 : vector<4x256xf32>
    %c240_i32_43 = arith.constant 240 : i32
    %90 = tpu.dynamic_rotate %65 by %c240_i32_43 dim 1 : vector<4x256xf32>, i32 -> vector<4x256xf32>
    %91 = vector.broadcast %6 : vector<1x256xf32> to vector<4x256xf32>
    %92 = arith.mulf %90, %91 : vector<4x256xf32>
    %c239_i32_44 = arith.constant 239 : i32
    %93 = tpu.dynamic_rotate %65 by %c239_i32_44 dim 1 : vector<4x256xf32>, i32 -> vector<4x256xf32>
    %94 = vector.broadcast %7 : vector<1x256xf32> to vector<4x256xf32>
    %95 = arith.mulf %93, %94 : vector<4x256xf32>
    %96 = tpu.concatenate %74, %77, %80, %83, %65, %86, %89, %92, %95 in 0 : vector<4x256xf32>, vector<4x256xf32>, vector<4x256xf32>, vector<4x256xf32>, vector<4x256xf32>, vector<4x256xf32>, vector<4x256xf32>, vector<4x256xf32>, vector<4x256xf32> -> vector<36x256xf32>
    %cst_45 = arith.constant dense<0.000000e+00> : vector<4x256xf32>
    %97 = tpu.matmul %67, %96, %cst_45 {dimension_numbers = #tpu.dot_dimension_numbers<[1], [0], [0], [1], [0, 0, 1, 1], [], []>} : vector<4x36xf32>, vector<36x256xf32>, vector<4x256xf32> -> vector<4x256xf32>
    %98 = vector.broadcast %69 : vector<4x1xf32> to vector<4x256xf32>
    %99 = arith.mulf %97, %98 : vector<4x256xf32>
    %100 = vector.broadcast %71 : vector<4x1xf32> to vector<4x256xf32>
    %101 = arith.addf %99, %100 : vector<4x256xf32>
    %102 = arith.negf %101 : vector<4x256xf32>
    %103 = math.exp %102 : vector<4x256xf32>
    %cst_46 = arith.constant 1.000000e+00 : f32
    %104 = vector.broadcast %cst_46 : f32 to vector<4x256xf32>
    %105 = arith.addf %104, %103 : vector<4x256xf32>
    %106 = arith.divf %104, %105 : vector<4x256xf32>
    %107 = arith.mulf %101, %106 : vector<4x256xf32>
    %108 = tpu.concatenate %22, %107 in 0 : vector<8x256xf32>, vector<4x256xf32> -> vector<12x256xf32>
    %c0_47 = arith.constant 0 : index
    %c0_48 = arith.constant 0 : index
    %109 = vector.load %arg9[%c0_47, %c0_48] : memref<8x12xf32, #tpu.memory_space<vmem>>, vector<8x12xf32>
    %cst_49 = arith.constant dense<0.000000e+00> : vector<8x256xf32>
    %110 = tpu.matmul %109, %108, %cst_49 {dimension_numbers = #tpu.dot_dimension_numbers<[1], [0], [0], [1], [0, 0, 1, 1], [], []>} : vector<8x12xf32>, vector<12x256xf32>, vector<8x256xf32> -> vector<8x256xf32>
    %c0_50 = arith.constant 0 : index
    %c0_51 = arith.constant 0 : index
    %111 = vector.load %arg10[%c0_50, %c0_51] : memref<8x1xf32, #tpu.memory_space<vmem>>, vector<8x1xf32>
    %112 = vector.broadcast %111 : vector<8x1xf32> to vector<8x256xf32>
    %113 = arith.mulf %110, %112 : vector<8x256xf32>
    %c0_52 = arith.constant 0 : index
    %c0_53 = arith.constant 0 : index
    %114 = vector.load %arg11[%c0_52, %c0_53] : memref<8x1xf32, #tpu.memory_space<vmem>>, vector<8x1xf32>
    %115 = vector.broadcast %114 : vector<8x1xf32> to vector<8x256xf32>
    %116 = arith.addf %113, %115 : vector<8x256xf32>
    %117 = arith.negf %116 : vector<8x256xf32>
    %118 = math.exp %117 : vector<8x256xf32>
    %cst_54 = arith.constant 1.000000e+00 : f32
    %119 = vector.broadcast %cst_54 : f32 to vector<8x256xf32>
    %120 = arith.addf %119, %118 : vector<8x256xf32>
    %121 = arith.divf %119, %120 : vector<8x256xf32>
    %122 = arith.mulf %116, %121 : vector<8x256xf32>
    %c0_55 = arith.constant 0 : index
    %c0_56 = arith.constant 0 : index
    %123 = vector.load %arg12[%c0_55, %c0_56] : memref<8x256xf32, #tpu.memory_space<vmem>>, vector<8x256xf32>
    tpu.vector_store %arg12[%c0_55, %c0_56], %122 {strides = array<i32>} : memref<8x256xf32, #tpu.memory_space<vmem>>, vector<8x256xf32>,
    return
  }
  func.func @transform_0(%arg0: i32) -> (i32, i32) {
    %c0_i32 = arith.constant 0 : i32
    %c0_i32_0 = arith.constant 0 : i32
    return %c0_i32, %arg0 : i32, i32
  }
  func.func @transform_1(%arg0: i32) -> (i32, i32) {
    %c0_i32 = arith.constant 0 : i32
    %c0_i32_0 = arith.constant 0 : i32
    %c0_i32_1 = arith.constant 0 : i32
    return %c0_i32, %c0_i32_0 : i32, i32
  }
  func.func @transform_2(%arg0: i32) -> (i32, i32) {
    %c0_i32 = arith.constant 0 : i32
    %c0_i32_0 = arith.constant 0 : i32
    %c0_i32_1 = arith.constant 0 : i32
    return %c0_i32, %c0_i32_0 : i32, i32
  }
  func.func @transform_3(%arg0: i32) -> (i32, i32) {
    %c0_i32 = arith.constant 0 : i32
    %c0_i32_0 = arith.constant 0 : i32
    %c0_i32_1 = arith.constant 0 : i32
    return %c0_i32, %c0_i32_0 : i32, i32
  }
  func.func @transform_4(%arg0: i32) -> (i32, i32) {
    %c0_i32 = arith.constant 0 : i32
    %c0_i32_0 = arith.constant 0 : i32
    %c0_i32_1 = arith.constant 0 : i32
    return %c0_i32, %c0_i32_0 : i32, i32
  }
  func.func @transform_5(%arg0: i32) -> (i32, i32, i32) {
    %c0_i32 = arith.constant 0 : i32
    %c0_i32_0 = arith.constant 0 : i32
    %c0_i32_1 = arith.constant 0 : i32
    %c0_i32_2 = arith.constant 0 : i32
    return %c0_i32, %c0_i32_0, %c0_i32_1 : i32, i32, i32
  }
  func.func @transform_6(%arg0: i32) -> (i32, i32, i32) {
    %c0_i32 = arith.constant 0 : i32
    %c0_i32_0 = arith.constant 0 : i32
    %c0_i32_1 = arith.constant 0 : i32
    %c0_i32_2 = arith.constant 0 : i32
    return %c0_i32, %c0_i32_0, %c0_i32_1 : i32, i32, i32
  }
  func.func @transform_7(%arg0: i32) -> (i32, i32, i32) {
    %c0_i32 = arith.constant 0 : i32
    %c0_i32_0 = arith.constant 0 : i32
    %c0_i32_1 = arith.constant 0 : i32
    %c0_i32_2 = arith.constant 0 : i32
    return %c0_i32, %c0_i32_0, %c0_i32_1 : i32, i32, i32
  }
  func.func @transform_8(%arg0: i32) -> (i32, i32) {
    %c0_i32 = arith.constant 0 : i32
    %c0_i32_0 = arith.constant 0 : i32
    %c0_i32_1 = arith.constant 0 : i32
    return %c0_i32, %c0_i32_0 : i32, i32
  }
  func.func @transform_9(%arg0: i32) -> (i32, i32) {
    %c0_i32 = arith.constant 0 : i32
    %c0_i32_0 = arith.constant 0 : i32
    %c0_i32_1 = arith.constant 0 : i32
    return %c0_i32, %c0_i32_0 : i32, i32
  }
  func.func @transform_10(%arg0: i32) -> (i32, i32) {
    %c0_i32 = arith.constant 0 : i32
    %c0_i32_0 = arith.constant 0 : i32
    %c0_i32_1 = arith.constant 0 : i32
    return %c0_i32, %c0_i32_0 : i32, i32
  }
  func.func @transform_11(%arg0: i32) -> (i32, i32) {
    %c0_i32 = arith.constant 0 : i32
    %c0_i32_0 = arith.constant 0 : i32
    return %c0_i32, %arg0 : i32, i32
  }
}

</mosaic_0001>

<bundles_post_ra>
// kernel: tpu_custom_call.1
= control target key start
LH: loop header
LB: loop body
LE: loop exit
PB: predicated region body
PF: predicated region fallthrough
CT: control target
= control target key end

     0   :  { %16 = vsyncpa [#allocation3], 0  ;;  %s1999_s0 = inlined_call_operand.vmem [shape: f32[8,512], index: 0, kind: input, shape index: {}]   ;;  %s2000_s1 = inlined_call_operand.hbm [shape: f32[9,256], index: 1, kind: input, shape index: {}]   ;;  %s2001_s2 = inlined_call_operand.vmem [shape: f32[8,8], index: 2, kind: input, shape index: {}]   ;;  %s2002_s3 = inlined_call_operand.vmem [shape: f32[8,1], index: 3, kind: input, shape index: {}]   ;;  %s2003_s4 = inlined_call_operand.vmem [shape: f32[8,1], index: 4, kind: input, shape index: {}]   ;;  %s2004_s5 = inlined_call_operand.vmem [shape: f32[1,4,36], index: 5, kind: input, shape index: {}]   ;;  %s2005_s6 = inlined_call_operand.vmem [shape: f32[1,4,1], index: 6, kind: input, shape index: {}]   ;;  %s2006_s7 = inlined_call_operand.vmem [shape: f32[1,4,1], index: 7, kind: input, shape index: {}]   ;;  %s2007_s8 = inlined_call_operand.vmem [shape: f32[8,12], index: 8, kind: input, shape index: {}]   ;;  %s2008_s9 = inlined_call_operand.vmem [shape: f32[8,1], index: 9, kind: input, shape index: {}]   ;;  %s2009_s10 = inlined_call_operand.vmem [shape: f32[8,1], index: 10, kind: input, shape index: {}]   ;;  %s2010_s11 = inlined_call_operand.hbm [shape: f32[8,512], index: 11, kind: output, shape index: {}]  }
   0x1   :  { %17 = vsyncpa [#allocation4], 0 }
   0x2   :  { %19 = vsyncpa [#allocation4 + $0x1], 0  ;;  %s1553_s17 = smov 0   ;;  %s1555_s18 = smov 0  }
   0x3   :  { %s1557_s19 = smov 0   ;;  %s1559_s20 = smov 0  }
   0x4 LB: > { %s1574_s21 = sadd.s32 4294967295, %s1476_s20   ;;  %s1230_s22 = sadd.s32 4294967294, %s1476_s20   ;;  %s1476_s20 = sphi %s1559_s20, %s2031_s20   ;;  %s1472_s19 = sphi %s1557_s19, %s2030_s19   ;;  %s1468_s18 = sphi %s1555_s18, %s2029_s18   ;;  %s1464_s17 = sphi %s1553_s17, %s2028_s17  }
   0x5   : > { %s1578_s23 = sadd.s32 1, %s1476_s20   ;;  %s268_s24 = sadd.s32 1, %s1472_s19 }
   0x6   : > { %s265_s25 = ssub.s32 %s1476_s20, %s1578_s23  ;;  %p278_p0 = scmp.ne.s32.totalorder %s1472_s19, %s1468_s18 }
   0x7   : > { %p266_p1 = scmp.eq.s32.totalorder %s265_s25, 0  ;;  %p279_p2 = scmp.eq.s32.totalorder %s1574_s21, 1 }
   0x8   : > { %p284_p3 = scmp.ne.s32.totalorder %s1468_s18, %s1464_s17  ;;  %p285_p4 = scmp.eq.s32.totalorder %s1230_s22, 1 }
   0x9   : > { %s1589_s26 = scalar_select %p266_p1, %s1472_s19, %s268_s24  }
   0xa   : > { %p1591_p5 = por %p279_p2, %p278_p0  ;;  %p1595_p6 = por %p285_p4, %p284_p3 }
   0xb   : > { %2016 = sst [smem:[#allocation8_spill]] %s1589_s26  ;;  %p1231_p7 = scmp.ge.s32.totalorder %s1476_s20, 1 }
   0xc   : > { %s2017_s27 = scalar_select %p1591_p5, 1, 0 }
   0xd   : > { %s2018_s28 = scalar_select %p1595_p6, 1, 0 }
   0xe   : > { %p292_p8 = scmp.lt.s32.totalorder %s1476_s20, 3  ;;  %p2011_p9 = scmp.eq.s32.totalorder %s1574_s21, 0 }
   0xf   : > { %s1478_s30 = smov [#allocation2]   ;;  %s1382_s16 = scalar_lea.hbm %s2000_s1, 512 }
  0x10   : > { %p1602_p10 = pnand %p1231_p7, %p292_p8  ;;  %s304_s12 = sshll.u32 %s1478_s30, 4  ;;  %s305_s12 = int_to_ptr.vmem [resolvable:$true] %s304_s12 }
  0x11   : > { %p1383_p13 = scmp.ne.s32.totalorder %s2000_s1, %s1382_s16  ;;  %p1389_p3 = scmp.lt.u32.totalorder %s1382_s16, %s2000_s1 }
  0x12   : > { %s2019_s29 = scalar_select %p1602_p10, 1, 0 }
  0x13   : > { %p1291_p11 = pneg %p1602_p10 }
  0x15   : > { %p1610_p12 = pnand %p2011_p9, %p1291_p11 }
  0x17   : > { %p1384_p0 = pneg %p1610_p12 }
  0x19   : > { %p1385_p1 = pnand %p1384_p0, %p1383_p13 }
  0x1b   : > { %p1386_p2 = pneg %p1385_p1 }
  0x1d   : > { %p1391_p4 = pnand %p1389_p3, %p1386_p2 }
  0x1f   : > { %1394 = shalt.err (!%p1391_p4)
}
  0x20   : > { %s1395_s26 = scalar_lea.vmem %s305_s12, 512  ;;  %p1403_p9 = scmp.lt.s32.totalorder %s305_s12, %s305_s12 }
  0x21   : > { %p1396_p7 = scmp.ne.s32.totalorder %s305_s12, %s1395_s26  ;;  %p1404_p6 = scmp.lt.s32.totalorder %s1395_s26, %s1395_s26 }
  0x23   : > { %p1398_p8 = pnand %p1396_p7, %p1384_p0  ;;  %p1405_p5 = por %p1404_p6, %p1403_p9 }
  0x25   : > { %p1399_p11 = pneg %p1398_p8 }
  0x27   : > { %p1406_p10 = pnand %p1405_p5, %p1399_p11 }
  0x29   : > { %1409 = shalt.err (!%p1406_p10)
}
  0x2a   : > { %s1479_s14 = smov 256   ;;  %s1480_s15 = smov 16  }
  0x2b   : > { %1294 = dma.hbm_to_vmem [thread:$0]  (!%p1610_p12), %s2000_s1, 512, %s305_s12, [#allocation3], %s1479_s14, %s1479_s14, %s1480_s15  }
  0x2c   : > { %p2021_p13 = scmp.ne.s32.totalorder %s2019_s29, 0 }
  0x2d   : > { %p2022_p1 = scmp.eq.s32.totalorder (!%p2021_p13), %s1574_s21, 0 }
  0x2e   : > { %356 = sbr.rel (%p2021_p13) target bundleno = 1370 (0x55a), region = 64 }
  0x35   : > { %1455 = dma.done.wait (%p2022_p1), [#allocation3], 512   ;;  %p2023_p0 = pmov %p2022_p1 }
  0x36   : > { %s1237_s26 = sshll.u32 %s1574_s21, 1  ;;  %v1481_v0 = vmov 0.0   ;;  %v1482_v1 = vmov 0   ;;  %v420_v4 = vld [vmem:[%s2001_s2] sm:$0xff]  ;;  %vm423_vm0 = vcmask 64512   ;;  %s1485_s12 = smov 17   ;;  %v539_v29 = vlaneseq }
  0x37   : > { %1457 = vsyncadd (%p2023_p0), [#allocation3], 4294966784  ;;  %p397_p5 = scmp.lt.s32.totalorder %s1237_s26, 3  ;;  %491 = vmatprep.mubr.f32.mxu0 %v1481_v0  ;;  %1348 = vset.pattern.permute.xlu0 %v1482_v1  ;;  %v421_v5 = vld [vmem:[%s2002_s3] sm:$0xff]  ;;  %s1486_s13 = smov 15   ;;  %vm721_vm6 = vcmask 1043456  }
  0x38   : > { %804 = vmatprep.mubr.f32.mxu1 %v1481_v0  ;;  %1349 = vset.pattern.permute.xlu1 %v1482_v1  ;;  %v422_v6 = vld [vmem:[%s2003_s4] sm:$0xff]  ;;  %s1488_s25 = smov 112   ;;  %s1489_s30 = smov 113   ;;  %v546_v32 = vshrl.u32 %v539_v29, 7  ;;  %v1700_v33 = vand.u32 127, %v539_v29  ;;  %vm730_vm10 = vcmask 293888  }
  0x39   : > { %s2033_s26 = smov (!%p397_p5, %s1237_s26), 3  ;;  %500 = vperm.xlu0 %1348, %v421_v5   ;;  %s1490_s14 = smov 111   ;;  %v527_v27 = vld [vmem:[%s2005_s6] sm:$0xf]  ;;  %vm1491_vm11 = vmmov 1   ;;  %vm1031_vm13 = vcmask 97280  }
  0x3a   : > { %s1238_s29 = sshll.u32 %s2033_s26, 3  ;;  %s1483_s26 = smov 1   ;;  %v528_v28 = vld [vmem:[%s2006_s7] sm:$0xf]  ;;  %v1702_v36 = vsub.s32 0, %v546_v32  ;;  %v1704_v37 = vsub.s32 1, %v546_v32  ;;  %vm1280_vm12 = vmpackc.low %vm721_vm6, %vm1491_vm11 }
  0x3b   : > { %s400_s16 = scalar_lea.vmem %s1999_s0, %s1238_s29  ;;  %s1484_s29 = smov 16   ;;  %v405_v38 = vld [vmem:[#allocation2 + $0x1] ss:$8 sm:$0x3]  ;;  %vm561_vm1 = vcmp.lt.s32.totalorder %v1700_v33, 16  ;;  %vm601_vm2 = vcmp.lt.s32.totalorder %v1700_v33, 1 }
  0x3c   : > { %v419_v2 = vld [vmem:[%s400_s16 + $0x8] sm:$0xff]  ;;  %v418_v3 = vld [vmem:[%s400_s16] sm:$0xff]  ;;  %s2014_s16 = smov 127   ;;  %v1709_v42 = vrot.slane %v405_v38, %v1702_v36  ;;  %v1712_v43 = vrot.slane %v405_v38, %v1704_v37  ;;  %vm541_vm3 = vcmp.lt.s32.totalorder %v1700_v33, 17  ;;  %vm581_vm4 = vcmp.lt.s32.totalorder %v1700_v33, 15  ;;  %s2024_s22 = smov 127  }
  0x3d   : > { %427 = vmatprep.subr.mxu0 %v419_v2  ;;  %507 = vperm.xlu0 %1348, %v422_v6   ;;  %v409_v39 = vld [vmem:[#allocation2 + $0x3] ss:$8 sm:$0x3]  ;;  %v403_v45 = vld [vmem:[#allocation2] ss:$8 sm:$0x3] }
  0x3e   : > { %428 = vmatpush1.msra.mxu0 %v418_v3  ;;  %v1715_v44 = vrot.slane %v409_v39, %v1702_v36  ;;  %v1722_v48 = vrot.slane %v409_v39, %v1704_v37  ;;  %v407_v51 = vld [vmem:[#allocation2 + $0x2] ss:$8 sm:$0x3]  ;;  %v1730_v53 = vrot.slane %v403_v45, %v1702_v36  ;;  %v1733_v54 = vrot.slane %v403_v45, %v1704_v37  ;;  %v413_v32 = vld [vmem:[#allocation2 + $0x6] ss:$8 sm:$0x3] }
  0x3f   : > { %1239 = vmatmul.mubr.msk.f32.vlgmr.msra.gmra.mrb[0].mxu0 %vm423_vm0, %v420_v4  ;;  %v1745_v62 = vrot.slane %v407_v51, %v1702_v36  ;;  %v1748_v63 = vrot.slane %v407_v51, %v1704_v37  ;;  %vm621_vm5 = vcmp.lt.s32.totalorder %v1700_v33, 127  ;;  %v411_v4 = vld [vmem:[#allocation2 + $0x5] ss:$8 sm:$0x3]  ;;  %vm661_vm7 = vcmp.lt.s32.totalorder %v1700_v33, 112  ;;  %p2025_p9 = scmp.ne.s32.totalorder %s2017_s27, 0 }
  0x40   : > { %1005 = vmatprep.mubr.f32.mxu0 %v1481_v0  ;;  %vm641_vm8 = vcmp.lt.s32.totalorder %v1700_v33, 113  ;;  %vm681_vm9 = vcmp.lt.s32.totalorder %v1700_v33, 111 }
  0xb8   : > { %v501_v7 = vpop.permute.xlu0 %500 }
  0xbc   : > { %v508_v11 = vpop.permute.xlu0 %507 }
 0x112   : > { %v493_v8 = vpop.f32.mrb[0].mxu0 }
 0x113   : > { %v503_v9 = vmul.f32 %v501_v7, %v493_v8  ;;  %v495_v10 = vpop.f32.mrb[1].mxu0 }
 0x114   : > { %v504_v12 = vmul.f32 %v501_v7, %v495_v10 }
 0x115   : > { %v510_v13 = vadd.f32 %v508_v11, %v503_v9 }
 0x116   : > { %v511_v14 = vadd.f32 %v508_v11, %v504_v12 }
 0x117   : > { %v1240_v15 = vmul.f32 -1.442695, %v510_v13 }
 0x118   : > { %v1241_v16 = vmul.f32 -1.442695, %v511_v14 }
 0x119   : > { %1350 = vpow2.f32 %v1240_v15  ;;  %v415_v15 = vld [vmem:[#allocation2 + $0x7] ss:$8 sm:$0x3] }
 0x11a   : > { %1352 = vpow2.f32 %v1241_v16 }
 0x123   : > { %v1351_v17 = vpop.eup %1350 }
 0x124   : > { %v1353_v18 = vpop.eup %1352  ;;  %v518_v19 = vadd.f32 1.0, %v1351_v17 }
 0x125   : > { %v519_v20 = vadd.f32 1.0, %v1353_v18 }
 0x126   : > { %1354 = vrcp.f32 %v518_v19 }
 0x127   : > { %1356 = vrcp.f32 %v519_v20 }
 0x130   : > { %v1355_v21 = vpop.eup %1354 }
 0x131   : > { %v1357_v22 = vpop.eup %1356  ;;  %v1652_v23 = vmul.f32 %v1355_v21, %v510_v13  ;;  %v1760_v13 = vrot.slane %v411_v4, %v1702_v36 }
 0x132   : > { %v1657_v25 = vmul.f32 %v1357_v22, %v511_v14  ;;  %v1763_v14 = vrot.slane %v411_v4, %v1704_v37 }
 0x133   : > { %v1655_v24 = vrot.slane %v1652_v23, 4 }
 0x134   : > { %v1664_v26 = vrot.slane %v1657_v25, 4 }
 0x135   : > { %597 = vrot.lane.b32.xlu0 %v1655_v24, %s1483_s26  ;;  %557 = vrot.lane.b32.xlu1 %v1655_v24, %s1484_s29 }
 0x139   : > { %535 = vrot.lane.b32.xlu0 %v1655_v24, %s1485_s12  ;;  %559 = vrot.lane.b32.xlu1 %v1664_v26, %s1484_s29 }
 0x13d   : > { %577 = vrot.lane.b32.xlu0 %v1655_v24, %s1486_s13  ;;  %599 = vrot.lane.b32.xlu1 %v1664_v26, %s1483_s26 }
 0x141   : > { %617 = vrot.lane.b32.xlu0 %v1655_v24, %s2014_s16  ;;  %537 = vrot.lane.b32.xlu1 %v1664_v26, %s1485_s12 }
 0x145   : > { %657 = vrot.lane.b32.xlu0 %v1655_v24, %s1488_s25  ;;  %579 = vrot.lane.b32.xlu1 %v1664_v26, %s1486_s13 }
 0x149   : > { %637 = vrot.lane.b32.xlu0 %v1655_v24, %s1489_s30  ;;  %619 = vrot.lane.b32.xlu1 %v1664_v26, %s2014_s16  ;;  %s1262_s16 = sshll.u32 %s1574_s21, 8 }
 0x14d   : > { %677 = vrot.lane.b32.xlu0 %v1655_v24, %s1490_s14  ;;  %659 = vrot.lane.b32.xlu1 %v1664_v26, %s1488_s25 }
 0x151   : > { %813 = vperm.xlu0 %1348, %v527_v27   ;;  %639 = vrot.lane.b32.xlu1 %v1664_v26, %s1489_s30 }
 0x155   : > { %679 = vrot.lane.b32.xlu1 %v1664_v26, %s1490_s14 }
 0x159   : > { %820 = vperm.xlu1 %1349, %v528_v28  }
 0x1a7   : > { %v598_v30 = vpop.permute.xlu0 %597  ;;  %v558_v31 = vpop.permute.xlu1 %557 }
 0x1ab   : > { %v536_v34 = vpop.permute.xlu0 %535  ;;  %v560_v35 = vpop.permute.xlu1 %559 }
 0x1ac   : > { %v562_v46 = vsel %vm561_vm1, %v558_v31, %v560_v35  ;;  %v563_v47 = vsel %vm561_vm1, %v560_v35, %v558_v31  ;;  %v1778_v31 = vrot.slane %v415_v15, %v1704_v37 }
 0x1ad   : > { %v575_v55 = vmul.f32 %v1709_v42, %v563_v47  ;;  %v576_v56 = vmul.f32 %v1712_v43, %v562_v46  ;;  %v1790_v47 = vrot.slane %v413_v32, %v1702_v36 }
 0x1af   : > { %v578_v40 = vpop.permute.xlu0 %577  ;;  %v600_v41 = vpop.permute.xlu1 %599  ;;  %v699_v5 = vrot.slane %v575_v55, 4  ;;  %v700_v6 = vrot.slane %v576_v56, 4 }
 0x1b0   : > { %v602_v49 = vsel %vm601_vm2, %v598_v30, %v600_v41  ;;  %v603_v50 = vsel %vm601_vm2, %v600_v41, %v598_v30  ;;  %v1775_v30 = vrot.slane %v415_v15, %v1702_v36 }
 0x1b1   : > { %v615_v59 = vmul.f32 %v1715_v44, %v603_v50  ;;  %v616_v60 = vmul.f32 %v1722_v48, %v602_v49  ;;  %v1793_v49 = vrot.slane %v413_v32, %v1704_v37  ;;  %v417_v50 = vld [vmem:[#allocation2 + $0x10] ss:$8 sm:$0x3] }
 0x1b3   : > { %v538_v52 = vpop.permute.xlu1 %537  ;;  %v618_v61 = vpop.permute.xlu0 %617  ;;  %v705_v9 = vrot.slane %v615_v59, 4  ;;  %v706_v10 = vrot.slane %v616_v60, 4 }
 0x1b4   : > { %v542_v57 = vsel %vm541_vm3, %v536_v34, %v538_v52  ;;  %v543_v58 = vsel %vm541_vm3, %v538_v52, %v536_v34 }
 0x1b5   : > { %v555_v1 = vmul.f32 %v1730_v53, %v543_v58  ;;  %v556_v2 = vmul.f32 %v1733_v54, %v542_v57  ;;  %v1801_v58 = vrot.slane %v417_v50, %v1704_v37 }
 0x1b7   : > { %v580_v3 = vpop.permute.xlu1 %579  ;;  %v658_v16 = vpop.permute.xlu0 %657  ;;  %v723_v18 = vsel %vm721_vm6, %v556_v2, %v700_v6  ;;  %v722_v20 = vsel %vm721_vm6, %v555_v1, %v699_v5 }
 0x1b8   : > { %v582_v7 = vsel %vm581_vm4, %v578_v40, %v580_v3  ;;  %v583_v8 = vsel %vm581_vm4, %v580_v3, %v578_v40 }
 0x1b9   : > { %v595_v11 = vmul.f32 %v1745_v62, %v583_v8  ;;  %v596_v12 = vmul.f32 %v1748_v63, %v582_v7 }
 0x1bb   : > { %v620_v17 = vpop.permute.xlu1 %619  ;;  %v725_v19 = vsel %vm721_vm6, %v596_v12, %v706_v10  ;;  %v724_v21 = vsel %vm721_vm6, %v595_v11, %v705_v9  ;;  %v638_v41 = vpop.permute.xlu0 %637  ;;  %v1814_v10 = vrot.slane %v417_v50, %v1702_v36  ;;  %v1824_v12 = vld [vmem:[%s2004_s5] sm:$0xf] }
 0x1bc   : > { %v622_v22 = vsel %vm621_vm5, %v618_v61, %v620_v17  ;;  %v623_v27 = vsel %vm621_vm5, %v620_v17, %v618_v61  ;;  %v1263_v28 = vpack.c.bf16 %v725_v19, %v723_v18  ;;  %v1265_v29 = vpack.c.bf16 %v724_v21, %v722_v20 }
 0x1bd   : > { %v635_v34 = vmul.f32 %v1760_v13, %v622_v22  ;;  %v636_v35 = vmul.f32 %v1763_v14, %v623_v27 }
 0x1be   : > { %1264 = vmatprep.subr.bf16.mxu1 %v1263_v28 }
 0x1bf   : > { %v660_v38 = vpop.permute.xlu1 %659  ;;  %1266 = vmatpush1.bf16.msra.mxu1 %v1265_v29  ;;  %v711_v51 = vrot.slane %v635_v34, 4  ;;  %v712_v52 = vrot.slane %v636_v35, 4  ;;  %v678_v2 = vpop.permute.xlu0 %677 }
 0x1c0   : > { %v662_v39 = vsel %vm661_vm7, %v658_v16, %v660_v38  ;;  %v663_v40 = vsel %vm661_vm7, %v660_v38, %v658_v16 }
 0x1c1   : > { %v675_v45 = vmul.f32 %v1775_v30, %v662_v39  ;;  %v676_v46 = vmul.f32 %v1778_v31, %v663_v40  ;;  %v727_v4 = vsel %vm721_vm6, %v1664_v26, %v712_v52  ;;  %v726_v6 = vsel %vm721_vm6, %v1655_v24, %v711_v51  ;;  %v1112_v40 = vld [vmem:[%s2008_s9] sm:$0xff] }
 0x1c3   : > { %v640_v55 = vpop.permute.xlu1 %639  ;;  %v717_v59 = vrot.slane %v675_v45, 4  ;;  %v718_v60 = vrot.slane %v676_v46, 4 }
 0x1c4   : > { %v642_v56 = vsel %vm641_vm8, %v638_v41, %v640_v55  ;;  %v643_v57 = vsel %vm641_vm8, %v640_v55, %v638_v41  ;;  %v1120_v41 = vld [vmem:[%s2009_s10] sm:$0xff] }
 0x1c5   : > { %v655_v61 = vmul.f32 %v1790_v47, %v642_v56  ;;  %v656_v1 = vmul.f32 %v1793_v49, %v643_v57 }
 0x1c7   : > { %v680_v3 = vpop.permute.xlu1 %679  ;;  %v729_v5 = vsel %vm721_vm6, %v656_v1, %v718_v60  ;;  %v728_v7 = vsel %vm721_vm6, %v655_v61, %v717_v59 }
 0x1c8   : > { %v683_v37 = vsel %vm681_vm9, %v680_v3, %v678_v2  ;;  %v1267_v8 = vpack.c.bf16 %v729_v5, %v727_v4  ;;  %v1269_v9 = vpack.c.bf16 %v728_v7, %v726_v6  ;;  %v682_v26 = vsel %vm681_vm9, %v678_v2, %v680_v3 }
 0x1c9   : > { %v696_v11 = vmul.f32 %v1801_v58, %v683_v37  ;;  %v695_v24 = vmul.f32 %v1814_v10, %v682_v26 }
 0x1ca   : > { %1268 = vmatprep.subr.bf16.mxu1 %v1267_v8 }
 0x1cb   : > { %1270 = vmatpush1.bf16.msra.mxu1 %v1269_v9 }
 0x1cc   : > { %1242 = vmatprep.subr.msk.mxu1 %vm721_vm6, %v696_v11 }
 0x1cf   : > { %1243 = vmatpush1.msk.msra.mxu1 %vm721_vm6, %v695_v24 }
 0x1d0   : > { %1244 = vmatmul.mubr.msk.f32.vlgmr.msra.gmra.mrb[0].mxu1 %vm730_vm10, %v1824_v12  ;;  %v1830_v36 = vpop.permute.xlu0 %813 }
 0x1d1   : > { %1105 = vmatprep.mubr.f32.mxu1 %v1481_v0 }
 0x1d8   : > { %v1832_v16 = vpop.permute.xlu1 %820 }
 0x2a3   : > { %v806_v15 = vpop.f32.mrb[0].mxu1 }
 0x2a4   : > { %v816_v17 = vmul.f32 %v1830_v36, %v806_v15  ;;  %v808_v18 = vpop.f32.mrb[1].mxu1 }
 0x2a5   : > { %v817_v19 = vmul.f32 %v1830_v36, %v808_v18 }
 0x2a6   : > { %v823_v20 = vadd.f32 %v1832_v16, %v816_v17 }
 0x2a7   : > { %v824_v21 = vadd.f32 %v1832_v16, %v817_v19 }
 0x2a8   : > { %v1245_v22 = vmul.f32 -1.442695, %v823_v20 }
 0x2a9   : > { %v1246_v27 = vmul.f32 -1.442695, %v824_v21 }
 0x2aa   : > { %1358 = vpow2.f32 %v1245_v22 }
 0x2ab   : > { %1360 = vpow2.f32 %v1246_v27 }
 0x2b4   : > { %v1359_v28 = vpop.eup %1358 }
 0x2b5   : > { %v1361_v0 = vpop.eup %1360  ;;  %v831_v29 = vadd.f32 1.0, %v1359_v28 }
 0x2b6   : > { %v832_v32 = vadd.f32 1.0, %v1361_v0 }
 0x2b7   : > { %1362 = vrcp.f32 %v831_v29 }
 0x2b8   : > { %1364 = vrcp.f32 %v832_v32 }
 0x2c1   : > { %v1363_v34 = vpop.eup %1362 }
 0x2c2   : > { %v1365_v35 = vpop.eup %1364  ;;  %v1838_v38 = vmul.f32 %v1363_v34, %v823_v20 }
 0x2c3   : > { %v1840_v39 = vmul.f32 %v1365_v35, %v824_v21 }
 0x2c4   : > { %847 = vrot.lane.b32.xlu0 %v1838_v38, %s1484_s29 }
 0x2c5   : > { %849 = vrot.lane.b32.xlu1 %v1840_v39, %s1484_s29 }
 0x2c8   : > { %863 = vrot.lane.b32.xlu0 %v1838_v38, %s1483_s26 }
 0x2c9   : > { %865 = vrot.lane.b32.xlu1 %v1840_v39, %s1483_s26 }
 0x2cc   : > { %839 = vrot.lane.b32.xlu0 %v1838_v38, %s1485_s12 }
 0x2cd   : > { %841 = vrot.lane.b32.xlu1 %v1840_v39, %s1485_s12  ;;  %s1957_s12 = scalar_lea.hbm %s2010_s11, %s1262_s16 }
 0x2d0   : > { %855 = vrot.lane.b32.xlu0 %v1838_v38, %s1486_s13 }
 0x2d1   : > { %857 = vrot.lane.b32.xlu1 %v1840_v39, %s1486_s13 }
 0x2d4   : > { %871 = vrot.lane.b32.xlu0 %v1838_v38, %s2024_s22 }
 0x2d5   : > { %873 = vrot.lane.b32.xlu1 %v1840_v39, %s2024_s22 }
 0x2d8   : > { %887 = vrot.lane.b32.xlu0 %v1838_v38, %s1488_s25 }
 0x2d9   : > { %889 = vrot.lane.b32.xlu1 %v1840_v39, %s1488_s25  ;;  %s1492_s25 = smov [#allocation5]  }
 0x2dc   : > { %879 = vrot.lane.b32.xlu0 %v1838_v38, %s1489_s30 }
 0x2dd   : > { %881 = vrot.lane.b32.xlu1 %v1840_v39, %s1489_s30  ;;  %s1414_s30 = sshll.u32 %s1492_s25, 4  ;;  %s1415_s30 = int_to_ptr.vmem [resolvable:$false] %s1414_s30 }
 0x2e0   : > { %895 = vrot.lane.b32.xlu0 %v1838_v38, %s1490_s14 }
 0x2e1   : > { %897 = vrot.lane.b32.xlu1 %v1840_v39, %s1490_s14  ;;  %s393_s14 = sand.u32 1, %s1468_s18  }
 0x2e2   : > { %s1236_s24 = sshll.u32 %s393_s14, 4  ;;  %s1145_s13 = scalar_lea.sflag [#allocation4], %s393_s14 }
 0x2e3   : > { %s395_s15 = scalar_lea.vmem [#allocation5], %s1236_s24  ;;  %s1416_s24 = scalar_lea.vmem %s1415_s30, 512 }
 0x2e4   : > { %1115 = vperm.xlu0 %1348, %v1112_v40   ;;  %s1159_s22 = sshll.u32 %s395_s15, 4  ;;  %s1959_s22 = int_to_ptr.vmem [resolvable:$true] %s1159_s22 }
 0x2e5   : > { %1123 = vperm.xlu1 %1349, %v1120_v41   ;;  %s1410_s21 = scalar_lea.vmem %s1959_s22, 256  ;;  %p1417_p2 = scmp.lt.s32.totalorder %s1959_s22, %s1415_s30 }
 0x2e6   : > { %p1411_p6 = scmp.ne.s32.totalorder %s1959_s22, %s1410_s21  ;;  %p1418_p3 = scmp.lt.s32.totalorder %s1416_s24, %s1410_s21 }
 0x2e8   : > { %p1412_p10 = pnand %p1411_p6, %p2025_p9  ;;  %p1419_p4 = por %p1418_p3, %p1417_p2 }
 0x2ea   : > { %p1413_p12 = pneg %p1412_p10 }
 0x2ec   : > { %p1420_p7 = pnand %p1419_p4, %p1413_p12 }
 0x336   : > { %v848_v45 = vpop.permute.xlu0 %847 }
 0x337   : > { %v850_v46 = vpop.permute.xlu1 %849 }
 0x338   : > { %v851_v52 = vsel %vm561_vm1, %v848_v45, %v850_v46  ;;  %v852_v55 = vsel %vm561_vm1, %v850_v46, %v848_v45 }
 0x339   : > { %v853_v61 = vmul.f32 %v852_v55, %v1709_v42  ;;  %v854_v1 = vmul.f32 %v851_v52, %v1712_v43 }
 0x33a   : > { %v864_v50 = vpop.permute.xlu0 %863 }
 0x33b   : > { %v866_v51 = vpop.permute.xlu1 %865  ;;  %v905_v9 = vrot.slane %v853_v61, 4  ;;  %v906_v42 = vrot.slane %v854_v1, 4 }
 0x33c   : > { %v867_v56 = vsel %vm601_vm2, %v864_v50, %v866_v51  ;;  %v868_v57 = vsel %vm601_vm2, %v866_v51, %v864_v50 }
 0x33d   : > { %v869_v4 = vmul.f32 %v868_v57, %v1715_v44  ;;  %v870_v5 = vmul.f32 %v867_v56, %v1722_v48 }
 0x33e   : > { %v840_v59 = vpop.permute.xlu0 %839 }
 0x33f   : > { %v842_v60 = vpop.permute.xlu1 %841  ;;  %v911_v26 = vrot.slane %v869_v4, 4  ;;  %v912_v24 = vrot.slane %v870_v5, 4 }
 0x340   : > { %v843_v2 = vsel %vm541_vm3, %v840_v59, %v842_v60  ;;  %v844_v3 = vsel %vm541_vm3, %v842_v60, %v840_v59 }
 0x341   : > { %v845_v7 = vmul.f32 %v844_v3, %v1730_v53  ;;  %v846_v37 = vmul.f32 %v843_v2, %v1733_v54 }
 0x342   : > { %v856_v6 = vpop.permute.xlu0 %855 }
 0x343   : > { %v858_v8 = vpop.permute.xlu1 %857  ;;  %v927_v53 = vsel %vm721_vm6, %v845_v7, %v905_v9  ;;  %v928_v18 = vsel %vm721_vm6, %v846_v37, %v906_v42 }
 0x344   : > { %v859_v43 = vsel %vm581_vm4, %v856_v6, %v858_v8  ;;  %v860_v11 = vsel %vm581_vm4, %v858_v8, %v856_v6 }
 0x345   : > { %v861_v44 = vmul.f32 %v860_v11, %v1745_v62  ;;  %v862_v48 = vmul.f32 %v859_v43, %v1748_v63 }
 0x346   : > { %v872_v15 = vpop.permute.xlu0 %871 }
 0x347   : > { %v929_v54 = vsel %vm721_vm6, %v861_v44, %v911_v26  ;;  %v874_v17 = vpop.permute.xlu1 %873  ;;  %v930_v19 = vsel %vm721_vm6, %v862_v48, %v912_v24  ;;  %v1030_v26 = vld [vmem:[%s2007_s8] sm:$0xff] }
 0x348   : > { %v875_v20 = vsel %vm621_vm5, %v872_v15, %v874_v17  ;;  %v876_v21 = vsel %vm621_vm5, %v874_v17, %v872_v15  ;;  %v1271_v22 = vpack.c.bf16 %v930_v19, %v928_v18  ;;  %v1273_v62 = vpack.c.bf16 %v929_v54, %v927_v53 }
 0x349   : > { %v877_v63 = vmul.f32 %v875_v20, %v1760_v13  ;;  %v878_v28 = vmul.f32 %v876_v21, %v1763_v14 }
 0x34a   : > { %v888_v27 = vpop.permute.xlu0 %887  ;;  %1272 = vmatprep.subr.bf16.mxu0 %v1271_v22 }
 0x34b   : > { %1274 = vmatpush1.bf16.msra.mxu0 %v1273_v62  ;;  %v890_v0 = vpop.permute.xlu1 %889  ;;  %v917_v41 = vrot.slane %v877_v63, 4  ;;  %v918_v45 = vrot.slane %v878_v28, 4 }
 0x34c   : > { %v891_v29 = vsel %vm661_vm7, %v888_v27, %v890_v0  ;;  %v892_v32 = vsel %vm661_vm7, %v890_v0, %v888_v27 }
 0x34d   : > { %v893_v34 = vmul.f32 %v891_v29, %v1775_v30  ;;  %v894_v35 = vmul.f32 %v892_v32, %v1778_v31  ;;  %v931_v30 = vsel %vm721_vm6, %v1838_v38, %v917_v41  ;;  %v932_v59 = vsel %vm721_vm6, %v1840_v39, %v918_v45 }
 0x34e   : > { %v880_v40 = vpop.permute.xlu0 %879 }
 0x34f   : > { %v882_v46 = vpop.permute.xlu1 %881  ;;  %v923_v50 = vrot.slane %v893_v34, 4  ;;  %v924_v51 = vrot.slane %v894_v35, 4 }
 0x350   : > { %v883_v13 = vsel %vm641_vm8, %v880_v40, %v882_v46  ;;  %v884_v14 = vsel %vm641_vm8, %v882_v46, %v880_v40 }
 0x351   : > { %v885_v52 = vmul.f32 %v883_v13, %v1790_v47  ;;  %v886_v55 = vmul.f32 %v884_v14, %v1793_v49 }
 0x352   : > { %v896_v56 = vpop.permute.xlu0 %895 }
 0x353   : > { %v933_v31 = vsel %vm721_vm6, %v885_v52, %v923_v50  ;;  %v898_v57 = vpop.permute.xlu1 %897  ;;  %v934_v60 = vsel %vm721_vm6, %v886_v55, %v924_v51 }
 0x354   : > { %v900_v61 = vsel %vm681_vm9, %v898_v57, %v896_v56  ;;  %v1275_v1 = vpack.c.bf16 %v934_v60, %v932_v59  ;;  %v1277_v2 = vpack.c.bf16 %v933_v31, %v931_v30  ;;  %v899_v49 = vsel %vm681_vm9, %v896_v56, %v898_v57 }
 0x355   : > { %v902_v47 = vmul.f32 %v900_v61, %v1801_v58  ;;  %v901_v38 = vmul.f32 %v899_v49, %v1814_v10 }
 0x356   : > { %1276 = vmatprep.subr.bf16.mxu0 %v1275_v1 }
 0x357   : > { %1278 = vmatpush1.bf16.msra.mxu0 %v1277_v2 }
 0x358   : > { %1247 = vmatprep.subr.msk.mxu0 %vm721_vm6, %v902_v47 }
 0x35b   : > { %1248 = vmatpush1.msk.msra.mxu0 %vm721_vm6, %v901_v38 }
 0x35c   : > { %1249 = vmatmul.mubr.msk.f32.vlgmr.msra.gmra.mrb[2].mxu0 %vm730_vm10, %v1824_v12 }
 0x363   : > { %v1116_v24 = vpop.permute.xlu0 %1115 }
 0x364   : > { %v1124_v53 = vpop.permute.xlu1 %1123 }
 0x42f   : > { %v1007_v39 = vpop.f32.mrb[2].mxu0 }
 0x430   : > { %v1012_v3 = vmul.f32 %v1007_v39, %v1830_v36  ;;  %v1009_v4 = vpop.f32.mrb[3].mxu0 }
 0x431   : > { %v1013_v58 = vmul.f32 %v1009_v4, %v1830_v36 }
 0x432   : > { %v1014_v33 = vadd.f32 %v1012_v3, %v1832_v16 }
 0x433   : > { %v1015_v5 = vadd.f32 %v1013_v58, %v1832_v16 }
 0x434   : > { %v1250_v6 = vmul.f32 -1.442695, %v1014_v33 }
 0x435   : > { %v1251_v7 = vmul.f32 -1.442695, %v1015_v5 }
 0x436   : > { %1366 = vpow2.f32 %v1250_v6 }
 0x437   : > { %1368 = vpow2.f32 %v1251_v7 }
 0x440   : > { %v1367_v10 = vpop.eup %1366 }
 0x441   : > { %v1369_v37 = vpop.eup %1368  ;;  %v1022_v8 = vadd.f32 1.0, %v1367_v10 }
 0x442   : > { %v1023_v9 = vadd.f32 1.0, %v1369_v37 }
 0x443   : > { %1370 = vrcp.f32 %v1022_v8 }
 0x444   : > { %1372 = vrcp.f32 %v1023_v9 }
 0x44d   : > { %v1371_v12 = vpop.eup %1370 }
 0x44e   : > { %v1373_v42 = vpop.eup %1372  ;;  %v1028_v43 = vmul.f32 %v1371_v12, %v1014_v33 }
 0x44f   : > { %v1029_v11 = vmul.f32 %v1373_v42, %v1015_v5 }
 0x450   : > { %v1282_v16 = vpack.c.bf16 %v1028_v43, %v1652_v23 }
 0x451   : > { %v1279_v36 = vpack.c.bf16 %v1029_v11, %v1657_v25 }
 0x453   : > { %1281 = vmatprep.subr.msk.bf16.mxu1 %vm1280_vm12, %v1279_v36 }
 0x454   : > { %1284 = vmatpush1.bf16.msk.msra.mxu1 %vm1280_vm12, %v1282_v16 }
 0x457   : > { %1254 = vmatmul.mubr.msk.f32.vlgmr.msra.gmra.mrb[2].mxu1 %vm1031_vm13, %v1030_v26 }
 0x52a   : > { %v1107_v44 = vpop.f32.mrb[2].mxu1 }
 0x52b   : > { %v1118_v48 = vmul.f32 %v1116_v24, %v1107_v44  ;;  %v1109_v15 = vpop.f32.mrb[3].mxu1 }
 0x52c   : > { %v1119_v54 = vmul.f32 %v1116_v24, %v1109_v15 }
 0x52d   : > { %v1126_v17 = vadd.f32 %v1124_v53, %v1118_v48 }
 0x52e   : > { %v1127_v25 = vadd.f32 %v1124_v53, %v1119_v54 }
 0x52f   : > { %v1255_v18 = vmul.f32 -1.442695, %v1126_v17 }
 0x530   : > { %v1256_v23 = vmul.f32 -1.442695, %v1127_v25 }
 0x531   : > { %1374 = vpow2.f32 %v1255_v18 }
 0x532   : > { %1376 = vpow2.f32 %v1256_v23 }
 0x53b   : > { %v1375_v19 = vpop.eup %1374 }
 0x53c   : > { %v1377_v20 = vpop.eup %1376  ;;  %v1134_v21 = vadd.f32 1.0, %v1375_v19 }
 0x53d   : > { %v1135_v22 = vadd.f32 1.0, %v1377_v20 }
 0x53e   : > { %1378 = vrcp.f32 %v1134_v21 }
 0x53f   : > { %1380 = vrcp.f32 %v1135_v22 }
 0x548   : > { %v1379_v62 = vpop.eup %1378 }
 0x549   : > { %v1381_v27 = vpop.eup %1380  ;;  %v1140_v63 = vmul.f32 %v1379_v62, %v1126_v17 }
 0x54a   : > { %v1141_v28 = vmul.f32 %v1381_v27, %v1127_v25 }
 0x54b   : > { %1142 = vst [vmem:[%s395_s15] sm:$0xff] %v1140_v63 }
 0x54c   : > { %1143 = vst [vmem:[%s395_s15 + $0x8] sm:$0xff] %v1141_v28 }
 0x54d   : > { %1423 = shalt.err (!%p1420_p7)
}
 0x54e   : > { %s1424_s14 = scalar_lea.hbm %s1957_s12, 256  ;;  %s1428_s26 = scalar_lea.hbm %s2010_s11, 512 }
 0x54f   : > { %p1425_p8 = scmp.ne.s32.totalorder %s1957_s12, %s1424_s14  ;;  %p1429_p1 = scmp.lt.u32.totalorder %s1957_s12, %s2010_s11 }
 0x550   : > { %p1430_p0 = scmp.lt.u32.totalorder %s1428_s26, %s1424_s14  ;;  %p1432_p6 = scmp.lt.u32.totalorder %s1424_s14, %s1957_s12 }
 0x551   : > { %p1426_p11 = pnand %p1425_p8, %p2025_p9 }
 0x552   : > { %p1431_p5 = por %p1430_p0, %p1429_p1 }
 0x553   : > { %p1427_p13 = pneg %p1426_p11 }
 0x554   : > { %p1433_p10 = por %p1432_p6, %p1431_p5 }
 0x556   : > { %p1434_p12 = pnand %p1433_p10, %p1427_p13 }
 0x558   : > { %1437 = shalt.err (!%p1434_p12)
}
 0x559   : > { %1289 = dma.vmem_to_hbm [thread:$0]  (%p2025_p9), %s1959_s22, 256, %s1957_s12, %s1145_s13  }
 0x55a PF: > { %p1301_p2 = scmp.ge.s32.totalorder %s1476_s20, 2  ;;  %s1171_s21 = sand.u32 1, %s1464_s17  }
 0x55b   : > { %p2026_p3 = scmp.ne.s32.totalorder %s2018_s28, 0  ;;  %s1172_s30 = scalar_lea.sflag [#allocation4], %s1171_s21 }
 0x55d   : > { %p1296_p4 = pnand %p1301_p2, %p2026_p3 }
 0x55f   : > { %1459 = dma.done.wait (!%p1296_p4), %s1172_s30, 256  }
 0x560   : > { %1461 = vsyncadd (!%p1296_p4), %s1172_s30, 4294967040  ;;  %s2027_s24 = sld [smem:[#allocation8_spill]]  ;;  %p22_p7 = scmp.ge.s32.totalorder %s1578_s23, 4  }
 0x561   : > { %s2028_s17 = smov %s1468_s18  ;;  %s2029_s18 = smov %s1472_s19 }
 0x562   : > { %s2031_s20 = smov %s1578_s23  ;;  %24 = sbr.rel (!%p22_p7) target bundleno = 4 (0x4), region = 111 }
 0x566   : > { %s2030_s19 = smov %s2027_s24 }
 0x569   :  { %1177 = vsyncpa [#allocation3], 1 }
 0x56a   :  { %1179 = vsyncpa [#allocation3 + $0x1], 1 }
 0x56b   :  { %1180 = vsyncpa [#allocation4], 1 }
 0x56c   :  { %1182 = vsyncpa [#allocation4 + $0x1], 1 }

</bundles_post_ra>
